<compile_context>
chip_gen: v6e
topology: v6e:2x2x1
jax: 0.10.0
libtpu: 0.0.40
codegen_flags: <defaults>
</compile_context>

<pallas_src>
import math

import jax
import jax.numpy as jnp
from jax.experimental import pallas as pl
from jax.experimental.pallas import tpu as pltpu


# --------------------------------------------------------------------------
# Kernel: one fused matmul + one bias add + one dense store per batch tile.
# --------------------------------------------------------------------------
def _ensemble_kernel(x_ref, w_ref, b_ref, o_ref):
    # x_ref: (bt, E*Cin)   w_ref: (E*Cin, E*Cout)   b_ref: (1, E*Cout)
    # o_ref: (bt, E*Cout)
    acc = jnp.dot(x_ref[...], w_ref[...], preferred_element_type=jnp.float32)
    acc = acc + b_ref[...].astype(jnp.float32)        # single VPU add (bcast row)
    o_ref[...] = acc.astype(o_ref.dtype)              # one lane-dense store


# --------------------------------------------------------------------------
# Parameter prep: build the block-diagonal weight / flat bias ONCE (not per
# forward call).  Cost: E x weight bytes, ~100 KiB at demo shapes.
# --------------------------------------------------------------------------
def prepare_ensemble_params(weight, bias=None):
    """weight: (E, Cin, Cout), bias: (E, Cout) or None
    -> (w_blockdiag: (E*Cin, E*Cout), bias_flat: (1, E*Cout))"""
    E, Cin, Cout = weight.shape
    eye = jnp.eye(E, dtype=weight.dtype)
    # w_bd[e*Cin + i, f*Cout + j] = weight[e, i, j] * (e == f)
    w_bd = jnp.einsum("eij,ef->eifj", weight, eye).reshape(E * Cin, E * Cout)
    if bias is None:
        b_flat = jnp.zeros((1, E * Cout), dtype=weight.dtype)
    else:
        b_flat = bias.reshape(1, E * Cout)
    return w_bd, b_flat


# --------------------------------------------------------------------------
# Forward wrapper.
# --------------------------------------------------------------------------
def ensemble_layer_forward(x, w_blockdiag, bias_flat, *, max_batch_tile=256):
    """x: (B, E, Cin);  w_blockdiag: (E*Cin, E*Cout);  bias_flat: (1, E*Cout)
    -> (B, E, Cout)"""
    B, E, Cin = x.shape
    K, N = w_blockdiag.shape
    assert K == E * Cin, "block-diagonal weight does not match input layout"
    assert N % E == 0
    Cout = N // E

    # Free contiguous reshape: (B, E, Cin) -> (B, E*Cin).  No transpose.
    x_flat = x.reshape(B, K)

    # Batch tiling.  At small B: single grid step, everything VMEM-resident.
    # At large B: >= 2 "parallel" steps -> both v7x TensorCores get work,
    # and per-tile VMEM stays modest (v5e 16 MiB / v7x 32 MiB scoped defaults).
    bt = B if B <= max_batch_tile else max_batch_tile
    grid = (pl.cdiv(B, bt),)

    itemsize = jnp.dtype(x.dtype).itemsize
    cost = pl.CostEstimate(
        flops=2 * B * E * Cin * Cout,
        transcendentals=0,
        bytes_accessed=(x_flat.size + w_blockdiag.size + bias_flat.size
                        + B * N) * itemsize,
    )

    out_flat = pl.pallas_call(
        _ensemble_kernel,
        out_shape=jax.ShapeDtypeStruct((B, N), x.dtype),
        grid_spec=pltpu.PrefetchScalarGridSpec(
            num_scalar_prefetch=0,
            grid=grid,
            in_specs=[
                # activations: tiled over batch only, lane-dense flat layout
                pl.BlockSpec((bt, K), lambda b: (b, 0)),
                # block-diagonal weight: whole, resident across batch tiles
                pl.BlockSpec((K, N), lambda b: (0, 0)),
                # flattened bias row: whole, resident
                pl.BlockSpec((1, N), lambda b: (0, 0)),
            ],
            out_specs=pl.BlockSpec((bt, N), lambda b: (b, 0)),
        ),
        compiler_params=pltpu.CompilerParams(
            dimension_semantics=("parallel",)),   # batch tiles -> megacore split
        cost_estimate=cost,
    )(x_flat, w_blockdiag, bias_flat)

    # Free contiguous reshape back: (B, E*Cout) -> (B, E, Cout).
    return out_flat.reshape(B, E, Cout)


# --------------------------------------------------------------------------
# Parameter init matching PyTorch reset_parameters: U(-sqrt(1/Cin), sqrt(1/Cin))
# --------------------------------------------------------------------------
def init_ensemble_params(key, ensemble_size, input_features, output_features,
                         dtype=jnp.float32):
    bound = math.sqrt(1.0 / input_features)
    kw, kb = jax.random.split(key)
    weight = jax.random.uniform(
        kw, (ensemble_size, input_features, output_features),
        minval=-bound, maxval=bound, dtype=dtype)
    bias = jax.random.uniform(
        kb, (ensemble_size, output_features),
        minval=-bound, maxval=bound, dtype=dtype)
    return weight, bias


if __name__ == "__main__":
    ensemble_size = 7
    batch = 8
    input_features = 32
    output_features = 16

    key = jax.random.PRNGKey(0)
    k_param, k_x = jax.random.split(key)

    weight, bias = init_ensemble_params(
        k_param, ensemble_size, input_features, output_features)

    # One-time prep of the fused (block-diagonal) parameters.
    w_bd, b_flat = prepare_ensemble_params(weight, bias)

    # input: (batch, ensemble, in_features)  -> 'abc'
    x = jax.random.normal(k_x, (batch, ensemble_size, input_features),
                          dtype=jnp.float32)

    out = ensemble_layer_forward(x, w_bd, b_flat)
    out = jax.block_until_ready(out)

    # reference check against plain-JAX einsum (same semantics as torch.einsum)
    ref = jnp.einsum('abc,bcd->abd', x, weight) + bias
    assert out.shape == (batch, ensemble_size, output_features)
    assert jnp.allclose(out, ref, atol=1e-5, rtol=1e-5)

    print("KERNEL_OK")
</pallas_src>

<mosaic_0001>
module attributes {stable_mosaic.version = 11 : i64} {
  func.func @_ensemble_kernel(%arg0: i32, %arg1: memref<8x224xf32, #tpu.memory_space<vmem>>, %arg2: memref<224x112xf32, #tpu.memory_space<vmem>>, %arg3: memref<1x112xf32, #tpu.memory_space<vmem>>, %arg4: memref<8x112xf32, #tpu.memory_space<vmem>>) attributes {dimension_semantics = [#tpu.dimension_semantics<parallel>], iteration_bounds = array<i64: 1>, scalar_prefetch = 0 : i64, scratch_operands = 0 : i64, tpu.core_type = #tpu.core_type<tc>, window_params = [{transform_indices = @transform_0, window_bounds = array<i64: 8, 224>}, {pipeline_mode = #tpu.pipeline_mode<synchronous>, transform_indices = @transform_1, window_bounds = array<i64: 224, 112>}, {pipeline_mode = #tpu.pipeline_mode<synchronous>, transform_indices = @transform_2, window_bounds = array<i64: 1, 112>}, {transform_indices = @transform_3, window_bounds = array<i64: 8, 112>}]} {
    %c0 = arith.constant 0 : index
    %c0_0 = arith.constant 0 : index
    %0 = vector.load %arg1[%c0, %c0_0] : memref<8x224xf32, #tpu.memory_space<vmem>>, vector<8x224xf32>
    %c0_1 = arith.constant 0 : index
    %c0_2 = arith.constant 0 : index
    %1 = vector.load %arg2[%c0_1, %c0_2] : memref<224x112xf32, #tpu.memory_space<vmem>>, vector<224x112xf32>
    %cst = arith.constant dense<0.000000e+00> : vector<8x112xf32>
    %2 = tpu.matmul %0, %1, %cst {dimension_numbers = #tpu.dot_dimension_numbers<[1], [0], [0], [1], [0, 0, 1, 1], [], []>} : vector<8x224xf32>, vector<224x112xf32>, vector<8x112xf32> -> vector<8x112xf32>
    %c0_3 = arith.constant 0 : index
    %c0_4 = arith.constant 0 : index
    %3 = vector.load %arg3[%c0_3, %c0_4] : memref<1x112xf32, #tpu.memory_space<vmem>>, vector<1x112xf32>
    %4 = vector.broadcast %3 : vector<1x112xf32> to vector<8x112xf32>
    %5 = arith.addf %2, %4 : vector<8x112xf32>
    %c0_5 = arith.constant 0 : index
    %c0_6 = arith.constant 0 : index
    %6 = vector.load %arg4[%c0_5, %c0_6] : memref<8x112xf32, #tpu.memory_space<vmem>>, vector<8x112xf32>
    tpu.vector_store %arg4[%c0_5, %c0_6], %5 {strides = array<i32>} : memref<8x112xf32, #tpu.memory_space<vmem>>, vector<8x112xf32>,
    return
  }
  func.func @transform_0(%arg0: i32) -> (i32, i32) {
    %c0_i32 = arith.constant 0 : i32
    %c0_i32_0 = arith.constant 0 : i32
    return %arg0, %c0_i32 : i32, i32
  }
  func.func @transform_1(%arg0: i32) -> (i32, i32) {
    %c0_i32 = arith.constant 0 : i32
    %c0_i32_0 = arith.constant 0 : i32
    %c0_i32_1 = arith.constant 0 : i32
    return %c0_i32, %c0_i32_0 : i32, i32
  }
  func.func @transform_2(%arg0: i32) -> (i32, i32) {
    %c0_i32 = arith.constant 0 : i32
    %c0_i32_0 = arith.constant 0 : i32
    %c0_i32_1 = arith.constant 0 : i32
    return %c0_i32, %c0_i32_0 : i32, i32
  }
  func.func @transform_3(%arg0: i32) -> (i32, i32) {
    %c0_i32 = arith.constant 0 : i32
    %c0_i32_0 = arith.constant 0 : i32
    return %arg0, %c0_i32 : i32, i32
  }
}

</mosaic_0001>

<bundles_post_ra>
// kernel: tpu_custom_call.1
= control target key start
LH: loop header
LB: loop body
LE: loop exit
PB: predicated region body
PF: predicated region fallthrough
CT: control target
= control target key end

     0   :  { %8 = vsyncpa [#allocation3], 0  ;;  %s310_s0 = inlined_call_operand.hbm [shape: f32[8,224], index: 0, kind: input, shape index: {}]   ;;  %s311_s1 = inlined_call_operand.hbm [shape: f32[224,112], index: 1, kind: input, shape index: {}]   ;;  %s312_s2 = inlined_call_operand.vmem [shape: f32[1,112], index: 2, kind: input, shape index: {}]   ;;  %s313_s3 = inlined_call_operand.hbm [shape: f32[8,112], index: 3, kind: output, shape index: {}]  }
   0x1   :  { %9 = vsyncpa [#allocation6], 0 }
   0x2   :  { %10 = vsyncpa [#allocation4], 0  ;;  %s244_s12 = smov [#allocation2]   ;;  %s245_s14 = smov [#allocation5]  }
   0x3   :  { %s17_s13 = sshll.u32 %s244_s12, 4  ;;  %s26_s15 = sshll.u32 %s245_s14, 4  ;;  %s18_s13 = int_to_ptr.vmem [resolvable:$true] %s17_s13  ;;  %s27_s15 = int_to_ptr.vmem [resolvable:$true] %s26_s15 }
   0x4   :  { %s186_s16 = scalar_lea.vmem %s18_s13, 256  ;;  %p191_p1 = scmp.lt.s32.totalorder %s18_s13, %s18_s13 }
   0x5   :  { %p187_p0 = scmp.ne.s32.totalorder %s18_s13, %s186_s16  ;;  %p192_p2 = scmp.lt.s32.totalorder %s186_s16, %s186_s16 }
   0x7   :  { %p193_p3 = por %p192_p2, %p191_p1 }
   0x9   :  { %p194_p4 = pnand %p193_p3, %p187_p0 }
   0xb   :  { %197 = shalt.err (!%p194_p4)
}
   0xc   :  { %20 = dma.hbm_to_vmem [thread:$0]  %s310_s0, 256, %s18_s13, [#allocation3]  }
   0xd   :  { %s206_s19 = scalar_lea.vmem %s27_s15, 3584  ;;  %p211_p6 = scmp.lt.s32.totalorder %s27_s15, %s27_s15 }
   0xe   :  { %p207_p5 = scmp.ne.s32.totalorder %s27_s15, %s206_s19  ;;  %p212_p7 = scmp.lt.s32.totalorder %s206_s19, %s206_s19 }
  0x10   :  { %p213_p8 = por %p212_p7, %p211_p6 }
  0x12   :  { %p214_p9 = pnand %p213_p8, %p207_p5 }
  0x14   :  { %217 = shalt.err (!%p214_p9)
}
  0x15   :  { %s246_s20 = smov 128   ;;  %s247_s21 = smov 8  }
  0x16   :  { %32 = dma.hbm_to_vmem [thread:$0]  %s311_s1, 3584, %s27_s15, [#allocation6], %s246_s20, %s246_s20, %s247_s21  }
  0x17   :  { %238 = dma.done.wait [#allocation3], 256  }
  0x18   :  { %239 = vsyncadd [#allocation3], 4294967040 }
  0x19   :  { %240 = dma.done.wait [#allocation6], 3584  }
  0x1a   :  { %241 = vsyncadd [#allocation6], 4294963712  ;;  %v248_v0 = vmov 0.0   ;;  %v58_v1 = vld [vmem:[#allocation5 + $0x78] sm:$0xff]  ;;  %v57_v2 = vld [vmem:[#allocation5 + $0x70] sm:$0xff]  ;;  %vm78_vm0 = vcmask 785408  }
  0x1b   :  { %82 = vmatprep.subr.mxu0 %v248_v0  ;;  %v56_v3 = vld [vmem:[#allocation5 + $0x68] sm:$0xff]  ;;  %v55_v4 = vld [vmem:[#allocation5 + $0x60] sm:$0xff]  ;;  %v54_v5 = vld [vmem:[#allocation5 + $0x58] sm:$0xff]  ;;  %s249_s24 = smov [#allocation7]   ;;  %vm152_vm1 = vcmask 916480  }
  0x1c   :  { %83 = vmatpush1.msra.mxu0 %v58_v1  ;;  %v53_v6 = vld [vmem:[#allocation5 + $0x50] sm:$0xff]  ;;  %v42_v7 = vld [vmem:[#allocation2 + $0x8] sm:$0xff]  ;;  %v52_v8 = vld [vmem:[#allocation5 + $0x48] sm:$0xff]  ;;  %s160_s25 = sshll.u32 %s249_s24, 4  ;;  %s161_s25 = int_to_ptr.vmem [resolvable:$true] %s160_s25 }
  0x1d   :  { %84 = vmatprep.subr.mxu0 %v248_v0  ;;  %171 = vmatprep.mubr.msk.f32.mxu0 %vm78_vm0, %v42_v7  ;;  %v51_v9 = vld [vmem:[#allocation5 + $0x40] sm:$0xff]  ;;  %v50_v10 = vld [vmem:[#allocation5 + $0x38] sm:$0xff]  ;;  %v49_v11 = vld [vmem:[#allocation5 + $0x30] sm:$0xff]  ;;  %s218_s26 = scalar_lea.vmem %s161_s25, 128  ;;  %p223_p11 = scmp.lt.s32.totalorder %s161_s25, %s161_s25 }
  0x1e   :  { %85 = vmatpush1.msra.mxu0 %v57_v2  ;;  %v48_v12 = vld [vmem:[#allocation5 + $0x28] sm:$0xff]  ;;  %v47_v13 = vld [vmem:[#allocation5 + $0x20] sm:$0xff]  ;;  %v46_v14 = vld [vmem:[#allocation5 + $0x18] sm:$0xff]  ;;  %p219_p10 = scmp.ne.s32.totalorder %s161_s25, %s218_s26  ;;  %p224_p12 = scmp.lt.s32.totalorder %s218_s26, %s218_s26 }
  0x1f   :  { %86 = vmatprep.subr.mxu0 %v248_v0  ;;  %v45_v15 = vld [vmem:[#allocation5 + $0x10] sm:$0xff]  ;;  %v44_v16 = vld [vmem:[#allocation5 + $0x8] sm:$0xff]  ;;  %v43_v17 = vld [vmem:[#allocation5] sm:$0xff] }
  0x20   :  { %87 = vmatpush1.msra.mxu0 %v56_v3  ;;  %v70_v18 = vld [vmem:[#allocation5 + $0xd8] sm:$0xff]  ;;  %v69_v19 = vld [vmem:[#allocation5 + $0xd0] sm:$0xff]  ;;  %v68_v20 = vld [vmem:[#allocation5 + $0xc8] sm:$0xff]  ;;  %p225_p13 = por %p224_p12, %p223_p11 }
  0x21   :  { %88 = vmatprep.subr.mxu0 %v248_v0  ;;  %v67_v21 = vld [vmem:[#allocation5 + $0xc0] sm:$0xff]  ;;  %v66_v22 = vld [vmem:[#allocation5 + $0xb8] sm:$0xff]  ;;  %v65_v23 = vld [vmem:[#allocation5 + $0xb0] sm:$0xff] }
  0x22   :  { %89 = vmatpush1.msra.mxu0 %v55_v4  ;;  %v64_v24 = vld [vmem:[#allocation5 + $0xa8] sm:$0xff]  ;;  %v63_v25 = vld [vmem:[#allocation5 + $0xa0] sm:$0xff]  ;;  %v62_v26 = vld [vmem:[#allocation5 + $0x98] sm:$0xff]  ;;  %p226_p0 = pnand %p225_p13, %p219_p10 }
  0x23   :  { %90 = vmatprep.subr.mxu0 %v248_v0  ;;  %v61_v27 = vld [vmem:[#allocation5 + $0x90] sm:$0xff]  ;;  %v60_v28 = vld [vmem:[#allocation5 + $0x88] sm:$0xff]  ;;  %v59_v29 = vld [vmem:[#allocation5 + $0x80] sm:$0xff] }
  0x24   :  { %91 = vmatpush1.msra.mxu0 %v54_v5  ;;  %v41_v30 = vld [vmem:[#allocation2] sm:$0xff] }
  0x25   :  { %92 = vmatprep.subr.mxu0 %v248_v0  ;;  %v170_v31 = vld [vmem:[%s312_s2] ss:$0 sm:$0xff] }
  0x26   :  { %93 = vmatpush1.msra.mxu0 %v53_v6 }
  0x27   :  { %94 = vmatprep.subr.mxu0 %v248_v0 }
  0x28   :  { %95 = vmatpush1.msra.mxu0 %v52_v8 }
  0x29   :  { %96 = vmatprep.subr.mxu0 %v248_v0 }
  0x2a   :  { %97 = vmatpush1.msra.mxu0 %v51_v9 }
  0x2b   :  { %98 = vmatprep.subr.mxu0 %v248_v0 }
  0x2c   :  { %99 = vmatpush1.msra.mxu0 %v50_v10 }
  0x2d   :  { %100 = vmatprep.subr.mxu0 %v248_v0 }
  0x2e   :  { %101 = vmatpush1.msra.mxu0 %v49_v11 }
  0x2f   :  { %102 = vmatprep.subr.mxu0 %v248_v0 }
  0x30   :  { %103 = vmatpush1.msra.mxu0 %v48_v12 }
  0x31   :  { %104 = vmatprep.subr.mxu0 %v248_v0 }
  0x32   :  { %105 = vmatpush1.msra.mxu0 %v47_v13 }
  0x33   :  { %106 = vmatprep.subr.mxu0 %v248_v0 }
  0x34   :  { %107 = vmatpush1.msra.mxu0 %v46_v14 }
  0x35   :  { %108 = vmatprep.subr.mxu0 %v248_v0 }
  0x36   :  { %109 = vmatpush1.msra.mxu0 %v45_v15 }
  0x37   :  { %110 = vmatprep.subr.mxu0 %v248_v0 }
  0x38   :  { %111 = vmatpush1.msra.mxu0 %v44_v16 }
  0x39   :  { %112 = vmatprep.subr.mxu0 %v248_v0 }
  0x3a   :  { %113 = vmatpush1.msra.mxu0 %v43_v17 }
  0x3b   :  { %122 = vmatprep.subr.mxu0 %v248_v0 }
  0x3c   :  { %123 = vmatpush2.msra.mxu0 %v70_v18 }
  0x3d   :  { %124 = vmatprep.subr.mxu0 %v248_v0 }
  0x3e   :  { %125 = vmatpush2.msra.mxu0 %v69_v19 }
  0x3f   :  { %126 = vmatprep.subr.mxu0 %v248_v0 }
  0x40   :  { %127 = vmatpush2.msra.mxu0 %v68_v20 }
  0x41   :  { %128 = vmatprep.subr.mxu0 %v248_v0 }
  0x42   :  { %129 = vmatpush2.msra.mxu0 %v67_v21 }
  0x43   :  { %130 = vmatprep.subr.mxu0 %v248_v0 }
  0x44   :  { %131 = vmatpush2.msra.mxu0 %v66_v22 }
  0x45   :  { %132 = vmatprep.subr.mxu0 %v248_v0 }
  0x46   :  { %133 = vmatpush2.msra.mxu0 %v65_v23 }
  0x47   :  { %134 = vmatprep.subr.mxu0 %v248_v0 }
  0x48   :  { %135 = vmatpush2.msra.mxu0 %v64_v24 }
  0x49   :  { %136 = vmatprep.subr.mxu0 %v248_v0 }
  0x4a   :  { %137 = vmatpush2.msra.mxu0 %v63_v25 }
  0x4b   :  { %138 = vmatprep.subr.mxu0 %v248_v0 }
  0x4c   :  { %139 = vmatpush2.msra.mxu0 %v62_v26 }
  0x4d   :  { %140 = vmatprep.subr.mxu0 %v248_v0 }
  0x4e   :  { %141 = vmatpush2.msra.mxu0 %v61_v27 }
  0x4f   :  { %142 = vmatprep.subr.mxu0 %v248_v0 }
  0x50   :  { %143 = vmatpush2.msra.mxu0 %v60_v28 }
  0x51   :  { %144 = vmatprep.subr.mxu0 %v248_v0 }
  0x52   :  { %145 = vmatpush2.msra.mxu0 %v59_v29 }
  0x53   :  { %147 = vmatmul.mubr.f32.vlgmr.msra.gmra.mxu0 %v41_v30 }
 0x113   :  { %v148_v32 = vpop.f32.mrf.mxu0 }
 0x114   :  { %v149_v33 = vadd.f32 %v170_v31, %v148_v32 }
 0x115   :  { %v150_v34 = vpop.f32.mrf.mxu0 }
 0x116   :  { %153 = vst.msk [vmem:[#allocation7] sm:$0xff] %vm152_vm1, %v149_v33 }
 0x117   :  { %229 = shalt.err (!%p226_p0)
}
 0x118   :  { %163 = dma.vmem_to_hbm [thread:$0]  %s161_s25, 128, %s313_s3, [#allocation4]  }
 0x119   :  { %242 = dma.done.wait [#allocation4], 128  }
 0x11a   :  { %243 = vsyncadd [#allocation4], 4294967168 }
 0x11b   :  { %167 = vsyncpa [#allocation3], 1 }
 0x11c   :  { %168 = vsyncpa [#allocation6], 1 }
 0x11d   :  { %169 = vsyncpa [#allocation4], 1 }

</bundles_post_ra>
